<compile_context>
chip_gen: v5e
topology: v5e:2x2
jax: 0.10.0
libtpu: 0.0.40
codegen_flags: <defaults>
</compile_context>

<pallas_src>
import jax
import jax.numpy as jnp
from jax.experimental import pallas as pl
from jax.experimental.pallas import tpu as pltpu


LANE = 128        # lane-dense column padding for hidden2 / output
MAX_TILE_B = 1024  # batch rows per grid step (multiple of 16; bf16 sublane tile)
MAX_TILE_K = 2048  # fc1 contraction tile (multiple of 128)


def _round_up(n, m):
    return ((n + m - 1) // m) * m


def ffnn_kernel(x_ref, w1_ref, b1_ref, w2_ref, b2_ref, w3_ref, b3_ref,
                o_ref, acc_ref):
    k = pl.program_id(1)

    @pl.when(k == 0)
    def _():
        acc_ref[...] = jnp.zeros_like(acc_ref)

    # fc1 partial contraction over the K tile (bf16 inputs, f32 accumulate).
    acc_ref[...] += jnp.dot(x_ref[...], w1_ref[...],
                            preferred_element_type=jnp.float32)

    @pl.when(k == pl.num_programs(1) - 1)
    def _():
        # fc1 epilogue (+ folded BN) + ReLU.  Dropout = identity in eval mode.
        h1 = jnp.maximum(acc_ref[...] + b1_ref[...], 0.0)

        # fc2 (+ folded BN) + ReLU.
        h2 = jnp.dot(h1.astype(jnp.bfloat16), w2_ref[...],
                     preferred_element_type=jnp.float32) + b2_ref[...]
        h2 = jnp.maximum(h2, 0.0)

        # fc3 (output columns zero-padded to LANE for lane-dense stores).
        out = jnp.dot(h2.astype(jnp.bfloat16), w3_ref[...],
                      preferred_element_type=jnp.float32) + b3_ref[...]
        o_ref[...] = out.astype(o_ref.dtype)


def ffnn_forward(x, folded_params, output_size):
    """x: [B, input_size] float32. Returns [B, output_size] float32."""
    (w1, b1, w2, b2, w3, b3) = folded_params
    B, input_size = x.shape
    k_full, h1p = w1.shape
    h2p = w2.shape[1]
    outp = w3.shape[1]

    # Batch tiling: >= 2 grid steps when possible (v7x has 2 TensorCores),
    # multiple of 16 (bf16 packing), capped at MAX_TILE_B.
    tile_b = min(MAX_TILE_B, _round_up(pl.cdiv(B, 2), 16))
    b_pad = _round_up(B, tile_b)

    # K tiling for the fc1 contraction (fold_params guarantees divisibility).
    tile_k = min(MAX_TILE_K, k_full)
    num_k = k_full // tile_k
    assert num_k * tile_k == k_full

    # Pad and cast x in the wrapper: bf16 halves the dominant HBM read.
    x = jnp.pad(x, ((0, b_pad - B), (0, k_full - input_size))).astype(jnp.bfloat16)

    grid = (b_pad // tile_b, num_k)
    const2d = lambda a: pl.BlockSpec(a.shape, lambda i, k: (0, 0))

    flops = 2 * b_pad * (k_full * h1p + h1p * h2p + h2p * outp)
    bytes_accessed = (b_pad * k_full * 2            # x (bf16)
                      + k_full * h1p * 2            # w1 (bf16)
                      + h1p * h2p * 2 + h2p * outp * 2
                      + b_pad * outp * 2)           # output (bf16)

    out = pl.pallas_call(
        ffnn_kernel,
        out_shape=jax.ShapeDtypeStruct((b_pad, outp), jnp.bfloat16),
        grid=grid,
        in_specs=[
            pl.BlockSpec((tile_b, tile_k), lambda i, k: (i, k)),   # x tile
            pl.BlockSpec((tile_k, h1p), lambda i, k: (k, 0)),      # w1 K tile
            const2d(b1),
            const2d(w2), const2d(b2),
            const2d(w3), const2d(b3),
        ],
        out_specs=pl.BlockSpec((tile_b, outp), lambda i, k: (i, 0)),
        scratch_shapes=[pltpu.VMEM((tile_b, h1p), jnp.float32)],   # fc1 acc
        compiler_params=pltpu.CompilerParams(
            dimension_semantics=("parallel", "arbitrary")),
        cost_estimate=pl.CostEstimate(flops=flops, transcendentals=0,
                                      bytes_accessed=bytes_accessed),
    )(x, w1, b1, w2, b2, w3, b3)

    return out[:B, :output_size].astype(jnp.float32)


def init_raw_params(key, input_size, hidden1, hidden2, output_size):
    """Torch-equivalent parameters. Linear weights stored as [in, out]."""
    ks = jax.random.split(key, 6)
    w1 = jax.random.normal(ks[0], (input_size, hidden1), jnp.float32) * 0.02
    b1 = jax.random.normal(ks[1], (1, hidden1), jnp.float32) * 0.02
    w2 = jax.random.normal(ks[2], (hidden1, hidden2), jnp.float32) * 0.02
    b2 = jax.random.normal(ks[3], (1, hidden2), jnp.float32) * 0.02
    w3 = jax.random.normal(ks[4], (hidden2, output_size), jnp.float32) * 0.02
    b3 = jax.random.normal(ks[5], (1, output_size), jnp.float32) * 0.02

    # BatchNorm1d at init: gamma=1, beta=0, running_mean=0, running_var=1.
    bn1 = dict(gamma=jnp.ones((1, hidden1)), beta=jnp.zeros((1, hidden1)),
               mean=jnp.zeros((1, hidden1)), var=jnp.ones((1, hidden1)))
    bn2 = dict(gamma=jnp.ones((1, hidden2)), beta=jnp.zeros((1, hidden2)),
               mean=jnp.zeros((1, hidden2)), var=jnp.ones((1, hidden2)))
    return (w1, b1, bn1, w2, b2, bn2, w3, b3)


def fold_params(raw, eps=1e-5):
    """Fold BN into the linear layers, zero-pad all dims to lane-aligned /
    K-tile-aligned widths, cast weights to bf16 (biases stay f32)."""
    (w1, b1, bn1, w2, b2, bn2, w3, b3) = raw
    in_size, h1 = w1.shape
    h2 = w2.shape[1]
    out_size = w3.shape[1]

    s1 = bn1["gamma"] / jnp.sqrt(bn1["var"] + eps)
    t1 = bn1["beta"] - bn1["mean"] * s1
    w1f = w1 * s1                       # [in, h1] * [1, h1]
    b1f = b1 * s1 + t1                  # [1, h1]

    s2 = bn2["gamma"] / jnp.sqrt(bn2["var"] + eps)
    t2 = bn2["beta"] - bn2["mean"] * s2
    w2f = w2 * s2
    b2f = b2 * s2 + t2

    # Lane/MXU-friendly zero padding. ReLU(0)=0 and zero weight rows/cols keep
    # the real columns exact.
    k_pad = _round_up(in_size, LANE)
    if k_pad > MAX_TILE_K:
        k_pad = _round_up(k_pad, MAX_TILE_K)
    h1p = _round_up(h1, LANE)
    h2p = _round_up(h2, LANE)
    outp = _round_up(out_size, LANE)

    w1p = jnp.pad(w1f, ((0, k_pad - in_size), (0, h1p - h1)))
    b1p = jnp.pad(b1f, ((0, 0), (0, h1p - h1)))
    w2p = jnp.pad(w2f, ((0, h1p - h1), (0, h2p - h2)))
    b2p = jnp.pad(b2f, ((0, 0), (0, h2p - h2)))
    w3p = jnp.pad(w3, ((0, h2p - h2), (0, outp - out_size)))
    b3p = jnp.pad(b3, ((0, 0), (0, outp - out_size)))

    return (w1p.astype(jnp.bfloat16), b1p.astype(jnp.float32),
            w2p.astype(jnp.bfloat16), b2p.astype(jnp.float32),
            w3p.astype(jnp.bfloat16), b3p.astype(jnp.float32))


def ffnn_reference(x, raw, eps=1e-5):
    """Pure-JAX f32 eval-mode reference for a sanity check."""
    (w1, b1, bn1, w2, b2, bn2, w3, b3) = raw
    s1 = bn1["gamma"] / jnp.sqrt(bn1["var"] + eps)
    t1 = bn1["beta"] - bn1["mean"] * s1
    s2 = bn2["gamma"] / jnp.sqrt(bn2["var"] + eps)
    t2 = bn2["beta"] - bn2["mean"] * s2
    h1 = jnp.maximum((x @ w1 + b1) * s1 + t1, 0.0)
    h2 = jnp.maximum((h1 @ w2 + b2) * s2 + t2, 0.0)
    return h2 @ w3 + b3


if __name__ == "__main__":
    key = jax.random.PRNGKey(0)
    batch = 19            # exercises batch padding + 2 batch grid steps
    input_size = 500      # stands in for the sparse TF-IDF feature dim (padded to 512)
    hidden_size1 = 128
    hidden_size2 = 64
    output_size = 7

    kx, kp = jax.random.split(key)
    x = jax.random.normal(kx, (batch, input_size), jnp.float32)
    raw = init_raw_params(kp, input_size, hidden_size1, hidden_size2, output_size)
    params = fold_params(raw)

    out = ffnn_forward(x, params, output_size)
    out = jax.block_until_ready(out)

    assert out.shape == (batch, output_size)
    ref = ffnn_reference(x, raw)
    assert bool(jnp.all(jnp.isfinite(out)))
    assert bool(jnp.allclose(out, ref, atol=2e-2, rtol=2e-2)), (
        float(jnp.max(jnp.abs(out - ref))))
    print("KERNEL_OK")
</pallas_src>

<mosaic_0001>
module attributes {stable_mosaic.version = 11 : i64} {
  func.func @ffnn_kernel(%arg0: i32, %arg1: i32, %arg2: memref<16x512xbf16, #tpu.memory_space<vmem>>, %arg3: memref<512x128xbf16, #tpu.memory_space<vmem>>, %arg4: memref<1x128xf32, #tpu.memory_space<vmem>>, %arg5: memref<128x128xbf16, #tpu.memory_space<vmem>>, %arg6: memref<1x128xf32, #tpu.memory_space<vmem>>, %arg7: memref<128x128xbf16, #tpu.memory_space<vmem>>, %arg8: memref<1x128xf32, #tpu.memory_space<vmem>>, %arg9: memref<16x128xbf16, #tpu.memory_space<vmem>>, %arg10: memref<16x128xf32, #tpu.memory_space<vmem>>) attributes {dimension_semantics = [#tpu.dimension_semantics<parallel>, #tpu.dimension_semantics<arbitrary>], iteration_bounds = array<i64: 2, 1>, scalar_prefetch = 0 : i64, scratch_operands = 1 : i64, tpu.core_type = #tpu.core_type<tc>, window_params = [{transform_indices = @transform_0, window_bounds = array<i64: 16, 512>}, {transform_indices = @transform_1, window_bounds = array<i64: 512, 128>}, {pipeline_mode = #tpu.pipeline_mode<synchronous>, transform_indices = @transform_2, window_bounds = array<i64: 1, 128>}, {pipeline_mode = #tpu.pipeline_mode<synchronous>, transform_indices = @transform_3, window_bounds = array<i64: 128, 128>}, {pipeline_mode = #tpu.pipeline_mode<synchronous>, transform_indices = @transform_4, window_bounds = array<i64: 1, 128>}, {pipeline_mode = #tpu.pipeline_mode<synchronous>, transform_indices = @transform_5, window_bounds = array<i64: 128, 128>}, {pipeline_mode = #tpu.pipeline_mode<synchronous>, transform_indices = @transform_6, window_bounds = array<i64: 1, 128>}, {transform_indices = @transform_7, window_bounds = array<i64: 16, 128>}]} {
    %c0_i32 = arith.constant 0 : i32
    %0 = arith.cmpi eq, %arg1, %c0_i32 : i32
    %1 = arith.extui %0 : i1 to i32
    %c0_i32_0 = arith.constant 0 : i32
    %2 = arith.cmpi ne, %1, %c0_i32_0 : i32
    scf.if %2 {
      %cst_10 = arith.constant 0.000000e+00 : f32
      %12 = vector.broadcast %cst_10 : f32 to vector<16x128xf32>
      %c0_11 = arith.constant 0 : index
      %c0_12 = arith.constant 0 : index
      %13 = vector.load %arg10[%c0_11, %c0_12] : memref<16x128xf32, #tpu.memory_space<vmem>>, vector<16x128xf32>
      tpu.vector_store %arg10[%c0_11, %c0_12], %12 {strides = array<i32>} : memref<16x128xf32, #tpu.memory_space<vmem>>, vector<16x128xf32>,
    } else {
    }
    %c0 = arith.constant 0 : index
    %c0_1 = arith.constant 0 : index
    %3 = vector.load %arg10[%c0, %c0_1] : memref<16x128xf32, #tpu.memory_space<vmem>>, vector<16x128xf32>
    %c0_2 = arith.constant 0 : index
    %c0_3 = arith.constant 0 : index
    %4 = vector.load %arg2[%c0_2, %c0_3] : memref<16x512xbf16, #tpu.memory_space<vmem>>, vector<16x512xbf16>
    %c0_4 = arith.constant 0 : index
    %c0_5 = arith.constant 0 : index
    %5 = vector.load %arg3[%c0_4, %c0_5] : memref<512x128xbf16, #tpu.memory_space<vmem>>, vector<512x128xbf16>
    %cst = arith.constant dense<0.000000e+00> : vector<16x128xf32>
    %6 = tpu.matmul %4, %5, %cst {dimension_numbers = #tpu.dot_dimension_numbers<[1], [0], [0], [1], [0, 0, 1, 1], [], []>} : vector<16x512xbf16>, vector<512x128xbf16>, vector<16x128xf32> -> vector<16x128xf32>
    %7 = arith.addf %3, %6 : vector<16x128xf32>
    %c0_6 = arith.constant 0 : index
    %c0_7 = arith.constant 0 : index
    %8 = vector.load %arg10[%c0_6, %c0_7] : memref<16x128xf32, #tpu.memory_space<vmem>>, vector<16x128xf32>
    tpu.vector_store %arg10[%c0_6, %c0_7], %7 {strides = array<i32>} : memref<16x128xf32, #tpu.memory_space<vmem>>, vector<16x128xf32>,
    %c0_i32_8 = arith.constant 0 : i32
    %9 = arith.cmpi eq, %arg1, %c0_i32_8 : i32
    %10 = arith.extui %9 : i1 to i32
    %c0_i32_9 = arith.constant 0 : i32
    %11 = arith.cmpi ne, %10, %c0_i32_9 : i32
    scf.if %11 {
      %c0_10 = arith.constant 0 : index
      %c0_11 = arith.constant 0 : index
      %12 = vector.load %arg10[%c0_10, %c0_11] : memref<16x128xf32, #tpu.memory_space<vmem>>, vector<16x128xf32>
      %c0_12 = arith.constant 0 : index
      %c0_13 = arith.constant 0 : index
      %13 = vector.load %arg4[%c0_12, %c0_13] : memref<1x128xf32, #tpu.memory_space<vmem>>, vector<1x128xf32>
      %14 = vector.broadcast %13 : vector<1x128xf32> to vector<16x128xf32>
      %15 = arith.addf %12, %14 : vector<16x128xf32>
      %cst_14 = arith.constant 0.000000e+00 : f32
      %16 = vector.broadcast %cst_14 : f32 to vector<16x128xf32>
      %17 = arith.maximumf %15, %16 : vector<16x128xf32>
      %18 = arith.truncf %17 : vector<16x128xf32> to vector<16x128xbf16>
      %c0_15 = arith.constant 0 : index
      %c0_16 = arith.constant 0 : index
      %19 = vector.load %arg5[%c0_15, %c0_16] : memref<128x128xbf16, #tpu.memory_space<vmem>>, vector<128x128xbf16>
      %cst_17 = arith.constant dense<0.000000e+00> : vector<16x128xf32>
      %20 = tpu.matmul %18, %19, %cst_17 {dimension_numbers = #tpu.dot_dimension_numbers<[1], [0], [0], [1], [0, 0, 1, 1], [], []>} : vector<16x128xbf16>, vector<128x128xbf16>, vector<16x128xf32> -> vector<16x128xf32>
      %c0_18 = arith.constant 0 : index
      %c0_19 = arith.constant 0 : index
      %21 = vector.load %arg6[%c0_18, %c0_19] : memref<1x128xf32, #tpu.memory_space<vmem>>, vector<1x128xf32>
      %22 = vector.broadcast %21 : vector<1x128xf32> to vector<16x128xf32>
      %23 = arith.addf %20, %22 : vector<16x128xf32>
      %cst_20 = arith.constant 0.000000e+00 : f32
      %24 = vector.broadcast %cst_20 : f32 to vector<16x128xf32>
      %25 = arith.maximumf %23, %24 : vector<16x128xf32>
      %26 = arith.truncf %25 : vector<16x128xf32> to vector<16x128xbf16>
      %c0_21 = arith.constant 0 : index
      %c0_22 = arith.constant 0 : index
      %27 = vector.load %arg7[%c0_21, %c0_22] : memref<128x128xbf16, #tpu.memory_space<vmem>>, vector<128x128xbf16>
      %cst_23 = arith.constant dense<0.000000e+00> : vector<16x128xf32>
      %28 = tpu.matmul %26, %27, %cst_23 {dimension_numbers = #tpu.dot_dimension_numbers<[1], [0], [0], [1], [0, 0, 1, 1], [], []>} : vector<16x128xbf16>, vector<128x128xbf16>, vector<16x128xf32> -> vector<16x128xf32>
      %c0_24 = arith.constant 0 : index
      %c0_25 = arith.constant 0 : index
      %29 = vector.load %arg8[%c0_24, %c0_25] : memref<1x128xf32, #tpu.memory_space<vmem>>, vector<1x128xf32>
      %30 = vector.broadcast %29 : vector<1x128xf32> to vector<16x128xf32>
      %31 = arith.addf %28, %30 : vector<16x128xf32>
      %32 = arith.truncf %31 : vector<16x128xf32> to vector<16x128xbf16>
      %c0_26 = arith.constant 0 : index
      %c0_27 = arith.constant 0 : index
      %33 = vector.load %arg9[%c0_26, %c0_27] : memref<16x128xbf16, #tpu.memory_space<vmem>>, vector<16x128xbf16>
      tpu.vector_store %arg9[%c0_26, %c0_27], %32 {strides = array<i32>} : memref<16x128xbf16, #tpu.memory_space<vmem>>, vector<16x128xbf16>,
    } else {
    }
    return
  }
  func.func @transform_0(%arg0: i32, %arg1: i32) -> (i32, i32) {
    %c0_i32 = arith.constant 0 : i32
    return %arg0, %arg1 : i32, i32
  }
  func.func @transform_1(%arg0: i32, %arg1: i32) -> (i32, i32) {
    %c0_i32 = arith.constant 0 : i32
    %c0_i32_0 = arith.constant 0 : i32
    return %arg1, %c0_i32 : i32, i32
  }
  func.func @transform_2(%arg0: i32, %arg1: i32) -> (i32, i32) {
    %c0_i32 = arith.constant 0 : i32
    %c0_i32_0 = arith.constant 0 : i32
    %c0_i32_1 = arith.constant 0 : i32
    return %c0_i32, %c0_i32_0 : i32, i32
  }
  func.func @transform_3(%arg0: i32, %arg1: i32) -> (i32, i32) {
    %c0_i32 = arith.constant 0 : i32
    %c0_i32_0 = arith.constant 0 : i32
    %c0_i32_1 = arith.constant 0 : i32
    return %c0_i32, %c0_i32_0 : i32, i32
  }
  func.func @transform_4(%arg0: i32, %arg1: i32) -> (i32, i32) {
    %c0_i32 = arith.constant 0 : i32
    %c0_i32_0 = arith.constant 0 : i32
    %c0_i32_1 = arith.constant 0 : i32
    return %c0_i32, %c0_i32_0 : i32, i32
  }
  func.func @transform_5(%arg0: i32, %arg1: i32) -> (i32, i32) {
    %c0_i32 = arith.constant 0 : i32
    %c0_i32_0 = arith.constant 0 : i32
    %c0_i32_1 = arith.constant 0 : i32
    return %c0_i32, %c0_i32_0 : i32, i32
  }
  func.func @transform_6(%arg0: i32, %arg1: i32) -> (i32, i32) {
    %c0_i32 = arith.constant 0 : i32
    %c0_i32_0 = arith.constant 0 : i32
    %c0_i32_1 = arith.constant 0 : i32
    return %c0_i32, %c0_i32_0 : i32, i32
  }
  func.func @transform_7(%arg0: i32, %arg1: i32) -> (i32, i32) {
    %c0_i32 = arith.constant 0 : i32
    %c0_i32_0 = arith.constant 0 : i32
    return %arg0, %c0_i32 : i32, i32
  }
}

</mosaic_0001>

<bundles_post_ra>
// kernel: tpu_custom_call.1
= control target key start
LH: loop header
LB: loop body
LE: loop exit
PB: predicated region body
PF: predicated region fallthrough
CT: control target
= control target key end

     0   :  { %s1884_s0 = inlined_call_operand.hbm [shape: bf16[32,512], index: 0, kind: input, shape index: {}]   ;;  %s1885_s1 = inlined_call_operand.hbm [shape: bf16[512,128], index: 1, kind: input, shape index: {}]   ;;  %s1886_s2 = inlined_call_operand.vmem [shape: f32[1,128], index: 2, kind: input, shape index: {}]   ;;  %s1887_s3 = inlined_call_operand.hbm [shape: bf16[128,128], index: 3, kind: input, shape index: {}]   ;;  %s1888_s4 = inlined_call_operand.vmem [shape: f32[1,128], index: 4, kind: input, shape index: {}]   ;;  %s1889_s5 = inlined_call_operand.hbm [shape: bf16[128,128], index: 5, kind: input, shape index: {}]   ;;  %s1890_s6 = inlined_call_operand.vmem [shape: f32[1,128], index: 6, kind: input, shape index: {}]   ;;  %s1891_s7 = inlined_call_operand.hbm [shape: bf16[32,128], index: 7, kind: output, shape index: {}]  }
   0x1   :  { %1895 = sst [smem:[#allocation18_spill]] %s1885_s1 }
   0x2   :  { %1896 = sst [smem:[#allocation19_spill]] %s1887_s3 }
   0x3   :  { %1897 = sst [smem:[#allocation20_spill]] %s1889_s5 }
   0x4   :  { %12 = vsyncpa [#allocation4], 0 }
   0x5   :  { %14 = vsyncpa [#allocation4 + $0x1], 0 }
   0x6   :  { %15 = vsyncpa [#allocation7], 0 }
   0x7   :  { %16 = vsyncpa [#allocation10], 0 }
   0x8   :  { %17 = vsyncpa [#allocation5], 0 }
   0x9   :  { %19 = vsyncpa [#allocation5 + $0x1], 0  ;;  %s1695_s24 = smov 0   ;;  %s1697_s25 = smov 0  }
   0xa   :  { %s1699_s26 = smov 0   ;;  %s1701_s27 = smov 0  }
   0xb   :  { %s1703_s28 = smov 0   ;;  %s1705_s29 = smov 0  }
   0xc LB: > { %1898 = sst [smem:[#allocation16_spill]] %s1644_s29  ;;  %s1042_s30 = sadd.s32 4294967295, %s1644_s29   ;;  %s1644_s29 = sphi %s1705_s29, %s25_s29   ;;  %s1640_s28 = sphi %s1703_s28, %s1917_s28   ;;  %s1636_s27 = sphi %s1701_s27, %s1916_s27   ;;  %s1632_s26 = sphi %s1699_s26, %s1915_s26   ;;  %s1628_s25 = sphi %s1697_s25, %s1914_s25   ;;  %s1624_s24 = sphi %s1695_s24, %s1913_s24  }
   0xd   : > { %s1043_s8 = sadd.s32 4294967294, %s1644_s29   ;;  %p59_p0 = scmp.ne.s32.totalorder %s1628_s25, %s1624_s24 }
   0xe   : > { %p1729_p1 = scmp.eq.s32.totalorder %s1042_s30, 0  ;;  %p1733_p2 = scmp.eq.s32.totalorder %s1042_s30, 1 }
   0xf   : > { %p220_p3 = scmp.eq.s32.totalorder %s1043_s8, 1  ;;  %p1044_p5 = scmp.ge.s32.totalorder %s1644_s29, 1 }
  0x10   : > { %p1739_p4 = por %p1729_p1, %p59_p0  ;;  %p227_p7 = scmp.lt.s32.totalorder %s1644_s29, 3 }
  0x11   : > { %p1744_p6 = por %p220_p3, %p59_p0  ;;  %s1903_s1 = sld [smem:[#allocation18_spill]] }
  0x12   : > { %p1752_p8 = pnand %p1044_p5, %p227_p7  ;;  %s1646_s17 = smov [#allocation6]  }
  0x13   : > { %s243_s18 = sshll.u32 %s1646_s17, 4  ;;  %p1048_p11 = scmp.ge.s32.totalorder %s1644_s29, 2  ;;  %s244_s18 = int_to_ptr.vmem [resolvable:$true] %s243_s18 }
  0x14   : > { %p1348_p9 = pneg %p1752_p8  ;;  %s1906_s3 = sld [smem:[#allocation19_spill]] }
  0x15   : > { %s1647_s23 = smov 64   ;;  %s1648_s30 = smov 4  }
  0x16   : > { %p1760_p10 = pnand %p1348_p9, %p1729_p1  ;;  %s1649_s8 = smov [#allocation8]  }
  0x17   : > { %s241_s15 = sshll.u32 %s1903_s1, 4  ;;  %s260_s13 = sshll.u32 %s1649_s8, 4  ;;  %s242_s15 = int_to_ptr.hbm [resolvable:$true] %s241_s15  ;;  %s261_s13 = int_to_ptr.vmem [resolvable:$true] %s260_s13 }
  0x18   : > { %1351 = dma.hbm_to_vmem [thread:$0]  (!%p1760_p10), %s242_s15, 4096, %s244_s18, [#allocation7], %s1647_s23, %s1647_s23, %s1648_s30  }
  0x19   : > { %s1907_s5 = sld [smem:[#allocation20_spill]]  ;;  %s1650_s20 = smov [#allocation9]  }
  0x1a   : > { %s258_s22 = sshll.u32 %s1906_s3, 4  ;;  %s277_s21 = sshll.u32 %s1650_s20, 4  ;;  %s259_s22 = int_to_ptr.hbm [resolvable:$true] %s258_s22  ;;  %s278_s21 = int_to_ptr.vmem [resolvable:$true] %s277_s21 }
  0x1b   : > { %1354 = dma.hbm_to_vmem [thread:$0]  (!%p1760_p10), %s259_s22, 1024, %s261_s13, [#allocation7], %s1647_s23, %s1647_s23, %s1648_s30  }
  0x1c   : > { %s37_s15 = sadd.s32 1, %s1640_s28  ;;  %s46_s18 = sadd.s32 1, %s1632_s26 }
  0x1d   : > { %p39_p12 = scmp.ge.s32.totalorder %s37_s15, 2  ;;  %p53_p13 = scmp.ne.s32.totalorder %s1632_s26, %s1628_s25 }
  0x1e   : > { %p54_p0 = scmp.eq.s32.totalorder %s1644_s29, 0  ;;  %p1369_p7 = scmp.lt.s32.totalorder %s1644_s29, 2 }
  0x1f   : > { %s275_s1 = sshll.u32 %s1907_s5, 4  ;;  %s1919_s15 = smov (%p39_p12, %s37_s15), 0  ;;  %s276_s1 = int_to_ptr.hbm [resolvable:$true] %s275_s1 }
  0x20   : > { %1357 = dma.hbm_to_vmem [thread:$0]  (!%p1760_p10), %s276_s1, 1024, %s278_s21, [#allocation10], %s1647_s23, %s1647_s23, %s1648_s30  }
  0x21   : > { %1908 = sst [smem:[#allocation17_spill]] %s1919_s15  ;;  %p1784_p3 = por %p54_p0, %p53_p13 }
  0x22   : > { %p1790_p5 = por %p1733_p2, %p53_p13  ;;  %s41_s19 = ssub.s32 %s1640_s28, %s1919_s15 }
  0x23   : > { %p44_p9 = scmp.eq.s32.totalorder %s41_s19, 0  ;;  %s294_s1 = sand.u32 1, %s1632_s26  }
  0x24   : > { %s1049_s23 = sshll.u32 %s294_s1, 5  ;;  %s1273_s13 = sshll.u32 %s1640_s28, 5 }
  0x25   : > { %s1799_s30 = scalar_select %p44_p9, %s1632_s26, %s46_s18  }
  0x26   : > { %s306_s20 = scalar_lea.hbm %s1884_s0, %s1273_s13  ;;  %s298_s21 = scalar_lea.vmem [#allocation3], %s1049_s23 }
  0x27   : > { %s309_s3 = sshll.u32 %s298_s21, 4  ;;  %s307_s10 = sshll.u32 %s306_s20, 4  ;;  %s310_s3 = int_to_ptr.vmem [resolvable:$true] %s309_s3  ;;  %s308_s10 = int_to_ptr.hbm [resolvable:$true] %s307_s10 }
  0x28   : > { %p1359_p2 = pnand %p1369_p7, %p1784_p3  ;;  %s295_s5 = scalar_lea.sflag [#allocation4], %s294_s1 }
  0x29   : > { %s1651_s15 = smov 256   ;;  %s1652_s29 = smov 16  }
  0x2a   : > { %1361 = dma.hbm_to_vmem [thread:$0]  (!%p1359_p2), %s308_s10, 512, %s310_s3, %s295_s5, %s1651_s15, %s1651_s15, %s1652_s29  }
  0x2b   : > { %321 = sbr.rel (%p1752_p8) target bundleno = 519 (0x207), region = 48  ;;  %s1810_s18 = sand.u32 (!%p1752_p8), 1, %s1628_s25  }
  0x2c   : > { %s1054_s19 = sshll.u32 (!%p1752_p8), %s1810_s18, 5  ;;  %s324_s23 = scalar_lea.sflag (!%p1752_p8), [#allocation4], %s1810_s18 }
  0x2d   : > { %s1814_s13 = scalar_lea.vmem (!%p1752_p8), [#allocation3], %s1054_s19 }
  0x30   : > { %1607 = dma.done.wait (%p1739_p4), %s324_s23, 512  }
  0x31   : > { %1609 = vsyncadd (%p1739_p4), %s324_s23, 4294966784 }
  0x32   : > { %1611 = dma.done.wait (%p1729_p1), [#allocation7], 5120  }
  0x33   : > { %1613 = vsyncadd (%p1729_p1), [#allocation7], 4294962176 }
  0x34   : > { %1615 = dma.done.wait (%p1729_p1), [#allocation10], 1024  }
  0x35   : > { %1617 = vsyncadd (%p1729_p1), [#allocation10], 4294966272  ;;  %v1285_v0 = vld [vmem:[#allocation6 + $0x38] sm:$0xff]  ;;  %v1284_v4 = vld [vmem:[#allocation6 + $0x30] sm:$0xff]  ;;  %s1058_s11 = sshll.u32 %s1810_s18, 3  ;;  %s1326_s16 = sshll.u32 %s1636_s27, 3 }
  0x36   : > { %v1293_v1 = vld [vmem:[#allocation6 + $0x78] sm:$0xff]  ;;  %666 = vmatpush.bf16.msra.mxu0 %v1285_v0  ;;  %v1292_v5 = vld [vmem:[#allocation6 + $0x70] sm:$0xff]  ;;  %v1283_v8 = vld [vmem:[#allocation6 + $0x28] sm:$0xff]  ;;  %s923_s1 = scalar_lea.hbm %s1891_s7, %s1326_s16  ;;  %s373_s20 = scalar_lea.vmem [#allocation11], %s1058_s11 }
  0x37   : > { %v1301_v2 = vld [vmem:[#allocation6 + $0xb8] sm:$0xff]  ;;  %680 = vmatpush.bf16.msra.mxu1 %v1293_v1  ;;  %v1300_v6 = vld [vmem:[#allocation6 + $0xb0] sm:$0xff]  ;;  %v1291_v9 = vld [vmem:[#allocation6 + $0x68] sm:$0xff]  ;;  %s924_s21 = sshll.u32 %s373_s20, 4  ;;  %s926_s10 = sshll.u32 %s923_s1, 4  ;;  %s925_s21 = int_to_ptr.vmem [resolvable:$true] %s924_s21  ;;  %s927_s10 = int_to_ptr.hbm [resolvable:$true] %s926_s10 }
  0x38   : > { %v1309_v3 = vld [vmem:[#allocation6 + $0xf8] sm:$0xff]  ;;  %694 = vmatpush.bf16.msra.mxu2 %v1301_v2  ;;  %v1308_v7 = vld [vmem:[#allocation6 + $0xf0] sm:$0xff]  ;;  %v1299_v10 = vld [vmem:[#allocation6 + $0xa8] sm:$0xff]  ;;  %s912_s27 = scalar_lea.sflag [#allocation5], %s1810_s18  ;;  %s1568_s19 = sshra.s32 %s927_s10, 4  ;;  %s1569_s19 = int_to_ptr.hbm [resolvable:$true] %s1568_s19 }
  0x39   : > { %708 = vmatpush.bf16.msra.mxu3 %v1309_v3  ;;  %v1307_v11 = vld [vmem:[#allocation6 + $0xe8] sm:$0xff]  ;;  %v1282_v12 = vld [vmem:[#allocation6 + $0x20] sm:$0xff]  ;;  %v1281_v16 = vld [vmem:[#allocation6 + $0x18] sm:$0xff]  ;;  %s1570_s23 = scalar_lea.hbm %s1569_s19, 8  ;;  %s1574_s5 = scalar_lea.hbm %s1891_s7, 16 }
  0x3a   : > { %667 = vmatpush.bf16.msra.mxu0 %v1284_v4  ;;  %v1290_v13 = vld [vmem:[#allocation6 + $0x60] sm:$0xff]  ;;  %v1289_v17 = vld [vmem:[#allocation6 + $0x58] sm:$0xff]  ;;  %v1280_v20 = vld [vmem:[#allocation6 + $0x10] sm:$0xff]  ;;  %p1571_p1 = scmp.ne.s32.totalorder %s1569_s19, %s1570_s23  ;;  %p1575_p10 = scmp.lt.s32.totalorder %s1569_s19, %s1891_s7 }
  0x3b   : > { %681 = vmatpush.bf16.msra.mxu1 %v1292_v5  ;;  %v1298_v14 = vld [vmem:[#allocation6 + $0xa0] sm:$0xff]  ;;  %v1297_v18 = vld [vmem:[#allocation6 + $0x98] sm:$0xff]  ;;  %v1288_v21 = vld [vmem:[#allocation6 + $0x50] sm:$0xff]  ;;  %p1576_p12 = scmp.lt.s32.totalorder %s1574_s5, %s1570_s23 }
  0x3c   : > { %695 = vmatpush.bf16.msra.mxu2 %v1300_v6  ;;  %v1306_v15 = vld [vmem:[#allocation6 + $0xe0] sm:$0xff]  ;;  %v1305_v19 = vld [vmem:[#allocation6 + $0xd8] sm:$0xff]  ;;  %v1296_v22 = vld [vmem:[#allocation6 + $0x90] sm:$0xff]  ;;  %p1572_p4 = pnand %p1571_p1, %p1790_p5 }
  0x3d   : > { %709 = vmatpush.bf16.msra.mxu3 %v1308_v7  ;;  %v1304_v23 = vld [vmem:[#allocation6 + $0xd0] sm:$0xff]  ;;  %v1279_v24 = vld [vmem:[#allocation6 + $0x8] sm:$0xff]  ;;  %v1278_v28 = vld [vmem:[#allocation6] sm:$0xff]  ;;  %p1577_p13 = por %p1576_p12, %p1575_p10 }
  0x3e   : > { %668 = vmatpush.bf16.msra.mxu0 %v1283_v8  ;;  %v1287_v25 = vld [vmem:[#allocation6 + $0x48] sm:$0xff]  ;;  %v1286_v29 = vld [vmem:[#allocation6 + $0x40] sm:$0xff]  ;;  %v1276_v33 = vld [vmem:[%s1814_s13 + $0xc] sm:$0xf0]  ;;  %p1573_p8 = pneg %p1572_p4 }
  0x3f   : > { %682 = vmatpush.bf16.msra.mxu1 %v1291_v9  ;;  %v1295_v26 = vld [vmem:[#allocation6 + $0x88] sm:$0xff]  ;;  %v1294_v30 = vld [vmem:[#allocation6 + $0x80] sm:$0xff]  ;;  %v1063_v35 = vld [vmem:[%s1814_s13 + $0x10] sm:$0xf0] }
  0x40   : > { %696 = vmatpush.bf16.msra.mxu2 %v1299_v10  ;;  %v1303_v27 = vld [vmem:[#allocation6 + $0xc8] sm:$0xff]  ;;  %v1302_v31 = vld [vmem:[#allocation6 + $0xc0] sm:$0xff]  ;;  %v1277_v37 = vld [vmem:[%s1814_s13 + $0x14] sm:$0xf0]  ;;  %p1578_p0 = pnand %p1577_p13, %p1573_p8 }
  0x41   : > { %710 = vmatpush.bf16.msra.mxu3 %v1307_v11  ;;  %v1061_v32 = vld [vmem:[%s1814_s13] sm:$0xf]  ;;  %v1274_v34 = vld [vmem:[%s1814_s13 + $0x4] sm:$0xf]  ;;  %v1069_v36 = vld [vmem:[%s1814_s13 + $0x8] sm:$0xf] }
  0x42   : > { %669 = vmatpush.bf16.msra.mxu0 %v1282_v12  ;;  %v1275_v38 = vld [vmem:[%s1814_s13 + $0xc] sm:$0xf]  ;;  %v1071_v39 = vld [vmem:[%s1814_s13 + $0x18] sm:$0xf0]  ;;  %v1062_v41 = vor.u32 %v1276_v33, %v1061_v32  ;;  %v1066_v42 = vor.u32 %v1274_v34, %v1063_v35  ;;  %v1070_v43 = vor.u32 %v1277_v37, %v1069_v36  ;;  %v1316_v45 = vld [vmem:[#allocation8 + $0x30] sm:$0xff] }
  0x43   : > { %683 = vmatpush.bf16.msra.mxu1 %v1290_v13  ;;  %v1317_v40 = vld [vmem:[#allocation8 + $0x38] sm:$0xff]  ;;  %v1074_v44 = vor.u32 %v1275_v38, %v1071_v39  ;;  %v1315_v46 = vld [vmem:[#allocation8 + $0x28] sm:$0xff]  ;;  %v1314_v47 = vld [vmem:[#allocation8 + $0x20] sm:$0xff] }
  0x44   : > { %697 = vmatpush.bf16.msra.mxu2 %v1298_v14  ;;  %v1313_v48 = vld [vmem:[#allocation8 + $0x18] sm:$0xff]  ;;  %v1312_v49 = vld [vmem:[#allocation8 + $0x10] sm:$0xff]  ;;  %v1311_v50 = vld [vmem:[#allocation8 + $0x8] sm:$0xff] }
  0x45   : > { %711 = vmatpush.bf16.msra.mxu3 %v1306_v15  ;;  %v1310_v51 = vld [vmem:[#allocation8] sm:$0xff]  ;;  %v1325_v52 = vld [vmem:[#allocation9 + $0x38] sm:$0xff]  ;;  %v1324_v53 = vld [vmem:[#allocation9 + $0x30] sm:$0xff] }
  0x46   : > { %670 = vmatpush.bf16.msra.mxu0 %v1281_v16  ;;  %v1323_v54 = vld [vmem:[#allocation9 + $0x28] sm:$0xff]  ;;  %v1322_v57 = vld [vmem:[#allocation9 + $0x20] sm:$0xff]  ;;  %v1321_v12 = vld [vmem:[#allocation9 + $0x18] sm:$0xff] }
  0x47   : > { %684 = vmatpush.bf16.msra.mxu1 %v1289_v17  ;;  %v1431_v1 = vld [vmem:[%s1886_s2] ss:$0 sm:$0xff]  ;;  %v1320_v13 = vld [vmem:[#allocation9 + $0x10] sm:$0xff]  ;;  %v1319_v14 = vld [vmem:[#allocation9 + $0x8] sm:$0xff] }
  0x48   : > { %698 = vmatpush.bf16.msra.mxu2 %v1297_v18  ;;  %v1318_v15 = vld [vmem:[#allocation9] sm:$0xff] }
  0x49   : > { %712 = vmatpush.bf16.msra.mxu3 %v1305_v19  ;;  %v1432_v17 = vld [vmem:[%s1888_s4] ss:$0 sm:$0xff] }
  0x4a   : > { %671 = vmatpush.bf16.msra.mxu0 %v1280_v20 }
  0x4b   : > { %685 = vmatpush.bf16.msra.mxu1 %v1288_v21 }
  0x4c   : > { %699 = vmatpush.bf16.msra.mxu2 %v1296_v22 }
  0x4d   : > { %713 = vmatpush.bf16.msra.mxu3 %v1304_v23 }
  0x4e   : > { %672 = vmatpush.bf16.msra.mxu0 %v1279_v24 }
  0x4f   : > { %686 = vmatpush.bf16.msra.mxu1 %v1287_v25  ;;  %v1433_v25 = vld [vmem:[%s1890_s6] ss:$0 sm:$0xff] }
  0x50   : > { %700 = vmatpush.bf16.msra.mxu2 %v1295_v26 }
  0x51   : > { %714 = vmatpush.bf16.msra.mxu3 %v1303_v27 }
  0x52   : > { %673 = vmatpush.bf16.msra.mxu0 %v1278_v28 }
  0x53   : > { %687 = vmatpush.bf16.msra.mxu1 %v1286_v29 }
  0x54   : > { %701 = vmatpush.bf16.msra.mxu2 %v1294_v30 }
  0x55   : > { %715 = vmatpush.bf16.msra.mxu3 %v1302_v31  ;;  %674 = vmatmul.bf16.vlgmr.msra.gmra.mxu0 %v1062_v41 }
  0x56   : > { %808 = vmatpush.bf16.msrb.mxu0 %v1317_v40  ;;  %688 = vmatmul.bf16.vlgmr.msra.gmra.mxu1 %v1066_v42 }
  0x57   : > { %702 = vmatmul.bf16.vlgmr.msra.gmra.mxu2 %v1070_v43  ;;  %893 = vmatpush.bf16.msrb.mxu1 %v1325_v52 }
  0x58   : > { %716 = vmatmul.bf16.vlgmr.msra.gmra.mxu3 %v1074_v44 }
  0x5a   : > { %809 = vmatpush.bf16.msrb.mxu0 %v1316_v45 }
  0x5b   : > { %894 = vmatpush.bf16.msrb.mxu1 %v1324_v53 }
  0x5e   : > { %810 = vmatpush.bf16.msrb.mxu0 %v1315_v46 }
  0x5f   : > { %895 = vmatpush.bf16.msrb.mxu1 %v1323_v54 }
  0x62   : > { %811 = vmatpush.bf16.msrb.mxu0 %v1314_v47 }
  0x63   : > { %896 = vmatpush.bf16.msrb.mxu1 %v1322_v57 }
  0x66   : > { %812 = vmatpush.bf16.msrb.mxu0 %v1313_v48 }
  0x67   : > { %897 = vmatpush.bf16.msrb.mxu1 %v1321_v12 }
  0x6a   : > { %813 = vmatpush.bf16.msrb.mxu0 %v1312_v49 }
  0x6b   : > { %898 = vmatpush.bf16.msrb.mxu1 %v1320_v13 }
  0x6e   : > { %814 = vmatpush.bf16.msrb.mxu0 %v1311_v50 }
  0x6f   : > { %899 = vmatpush.bf16.msrb.mxu1 %v1319_v14 }
  0x72   : > { %815 = vmatpush.bf16.msrb.mxu0 %v1310_v51 }
  0x73   : > { %900 = vmatpush.bf16.msrb.mxu1 %v1318_v15 }
  0xd2   : > { %v675_v55 = vpop.f32.mrf.mxu0 }
  0xd3   : > { %v689_v56 = vpop.f32.mrf.mxu1 }
  0xd4   : > { %v690_v58 = vadd.f32 %v689_v56, %v675_v55 }
  0xda   : > { %v703_v59 = vpop.f32.mrf.mxu2  ;;  %v677_v62 = vpop.f32.mrf.mxu0 }
  0xdb   : > { %v717_v60 = vpop.f32.mrf.mxu3  ;;  %v704_v61 = vadd.f32 %v703_v59, %v690_v58  ;;  %v691_v63 = vpop.f32.mrf.mxu1 }
  0xdc   : > { %v692_v2 = vadd.f32 %v691_v63, %v677_v62 }
  0xdd   : > { %v718_v0 = vadd.f32 %v717_v60, %v704_v61 }
  0xdf   : > { %v735_v6 = vadd.f32 %v1431_v1, %v718_v0 }
  0xe1   : > { %v737_v9 = vmax.f32 %v735_v6, 0.0 }
  0xe2   : > { %v705_v3 = vpop.f32.mrf.mxu2 }
  0xe3   : > { %v706_v4 = vadd.f32 %v705_v3, %v692_v2  ;;  %v719_v5 = vpop.f32.mrf.mxu3 }
  0xe5   : > { %v720_v7 = vadd.f32 %v719_v5, %v706_v4 }
  0xe7   : > { %v736_v8 = vadd.f32 %v1431_v1, %v720_v7 }
  0xe9   : > { %v738_v10 = vmax.f32 %v736_v8, 0.0 }
  0xeb   : > { %v739_v11 = vpack.c.bf16 %v738_v10, %v737_v9 }
  0xed   : > { %816 = vmatmul.bf16.vlgmr.msrb.gmra.mxu0 %v739_v11 }
 0x16a   : > { %v817_v16 = vpop.f32.mrf.mxu0 }
 0x16b   : > { %v818_v18 = vadd.f32 %v1432_v17, %v817_v16 }
 0x16d   : > { %v822_v21 = vmax.f32 %v818_v18, 0.0 }
 0x172   : > { %v819_v19 = vpop.f32.mrf.mxu0 }
 0x173   : > { %v820_v20 = vadd.f32 %v1432_v17, %v819_v19 }
 0x175   : > { %v823_v22 = vmax.f32 %v820_v20, 0.0 }
 0x177   : > { %v824_v23 = vpack.c.bf16 %v823_v22, %v822_v21 }
 0x179   : > { %901 = vmatmul.bf16.vlgmr.msrb.gmra.mxu1 %v824_v23 }
 0x1f6   : > { %v902_v24 = vpop.f32.mrf.mxu1 }
 0x1f7   : > { %v903_v27 = vadd.f32 %v1433_v25, %v902_v24 }
 0x1fe   : > { %v904_v26 = vpop.f32.mrf.mxu1 }
 0x1ff   : > { %v905_v28 = vadd.f32 %v1433_v25, %v904_v26 }
 0x201   : > { %v1330_v29 = vpack.c.bf16 %v905_v28, %v903_v27 }
 0x203   : > { %1331 = vst [vmem:[%s373_s20] sm:$0xff] %v1330_v29  }
 0x204   : > { %1581 = shalt.err (!%p1578_p0)
}
 0x205   : > { %s1653_s18 = smov 64   ;;  %s1654_s11 = smov 4  }
 0x206   : > { %1346 = dma.vmem_to_hbm [thread:$0]  (%p1790_p5), %s925_s21, 128, %s927_s10, %s912_s27, %s1653_s18, %s1653_s18, %s1654_s11  }
 0x207 PF: > { %s1911_s16 = sld [smem:[#allocation16_spill]]  ;;  %s941_s15 = sand.u32 1, %s1624_s24  }
 0x208   : > { %p1363_p3 = pnand %p1048_p11, %p1744_p6  ;;  %s942_s8 = scalar_lea.sflag [#allocation5], %s941_s15 }
 0x20a   : > { %p1364_p7 = pneg %p1363_p3 }
 0x20c   : > { %1619 = dma.done.wait (%p1364_p7), %s942_s8, 128  }
 0x20d   : > { %1621 = vsyncadd (%p1364_p7), %s942_s8, 4294967168  ;;  %s25_s29 = sadd.s32 1, %s1911_s16   ;;  %s1912_s22 = sld [smem:[#allocation17_spill]] }
 0x20e   : > { %p22_p9 = scmp.ge.s32.totalorder %s25_s29, 4   ;;  %s1913_s24 = smov %s1628_s25 }
 0x20f   : > { %s1914_s25 = smov %s1632_s26  ;;  %s1915_s26 = smov %s1799_s30 }
 0x210   : > { %s1916_s27 = smov %s1640_s28  ;;  %24 = sbr.rel (!%p22_p9) target bundleno = 12 (0xc), region = 114 }
 0x213   : > { %s1917_s28 = smov %s1912_s22 }
 0x215   :  { %948 = vsyncpa [#allocation4], 1 }
 0x216   :  { %950 = vsyncpa [#allocation4 + $0x1], 1 }
 0x217   :  { %951 = vsyncpa [#allocation7], 1 }
 0x218   :  { %952 = vsyncpa [#allocation10], 1 }
 0x219   :  { %953 = vsyncpa [#allocation5], 1 }
 0x21a   :  { %955 = vsyncpa [#allocation5 + $0x1], 1 }

</bundles_post_ra>
